<compile_context>
chip_gen: v5e
topology: v5e:2x2
jax: 0.10.0
libtpu: 0.0.40
codegen_flags: <defaults>
</compile_context>

<pallas_src>
import math
import functools

import jax
import jax.numpy as jnp
from jax.experimental import pallas as pl
from jax.experimental.pallas import tpu as pltpu


def _layernorm(x, gamma, beta, eps=1e-6):
    mean = jnp.mean(x, axis=-1, keepdims=True)
    var = jnp.mean((x - mean) ** 2, axis=-1, keepdims=True)
    return (x - mean) * jax.lax.rsqrt(var + eps) * gamma + beta


def sasrec_block_kernel(
    x_ref, mask_ref,
    wqkv_ref, wo_ref,
    ln1_g_ref, ln1_b_ref,
    w1_ref, b1_ref, w2_ref, b2_ref,
    ln2_g_ref, ln2_b_ref,
    out_ref, attn_ref,
    o_scr,
    *, num_heads, hidden_units, seq_len, block_b, compute_dtype,
):
    TB, L, H, NH = block_b, seq_len, hidden_units, num_heads
    dh = H // NH
    cdt = compute_dtype

    def mm(a, b):  # MXU matmul, f32 accumulation
        return jnp.dot(a.astype(cdt), b.astype(cdt),
                       preferred_element_type=jnp.float32)

    x = x_ref[...]                                   # (TB, L, H)
    xf = x.reshape(TB * L, H)

    # Hoisted out of the head loop: computed once, reused by every head.
    mask_is_zero = mask_ref[...] == 0                # (TB, L, L) bool

    # Fused QKV projection (1/sqrt(H) already folded into the Q columns).
    qkv = mm(xf, wqkv_ref[...])                      # (TB*L, 3H) f32
    q = qkv[:, 0 * H:1 * H].reshape(TB, L, H)
    k = qkv[:, 1 * H:2 * H].reshape(TB, L, H)
    v = qkv[:, 2 * H:3 * H].reshape(TB, L, H)

    # --- Multi-head scaled-dot-product attention (dropout = identity) ---
    for h in range(NH):
        sl = slice(h * dh, (h + 1) * dh)
        qh, kh, vh = q[..., sl], k[..., sl], v[..., sl]
        s = jnp.einsum('bqd,bkd->bqk', qh.astype(cdt), kh.astype(cdt),
                       preferred_element_type=jnp.float32)          # (TB, L, L)
        s = jnp.where(mask_is_zero, jnp.float32(-1e9), s)
        s = s - jnp.max(s, axis=-1, keepdims=True)
        p_un = jnp.exp(s)
        inv = pl.reciprocal(jnp.sum(p_un, axis=-1, keepdims=True), approx=True)
        p = p_un * inv
        attn_ref[:, h, :, :] = p                     # direct in-place slice store
        o_scr[:, :, sl] = jnp.einsum('bqk,bkd->bqd', p.astype(cdt), vh.astype(cdt),
                                     preferred_element_type=jnp.float32)

    # Output projection + residual + LayerNorm
    o = mm(o_scr[...].reshape(TB * L, H), wo_ref[...])
    o = _layernorm(o + xf, ln1_g_ref[...], ln1_b_ref[...])

    # --- Position-wise feed-forward + residual + LayerNorm ---
    h1 = jnp.maximum(mm(o, w1_ref[...]) + b1_ref[...], 0.0)
    h2 = mm(h1, w2_ref[...]) + b2_ref[...]
    out = _layernorm(h2 + o, ln2_g_ref[...], ln2_b_ref[...])

    out_ref[...] = out.reshape(TB, L, H)


def _pick_block_b(B, L, target_rows=128):
    """Pick batch rows per grid step: aim for ~128 MXU rows, keep grid >= 2."""
    tb = max(1, target_rows // max(L, 1))
    tb = min(tb, B)
    if B >= 2:
        tb = min(tb, max(1, B // 2))     # keep >= 2 grid steps (v7x: 2 TCs)
    while B % tb:
        tb -= 1
    return max(tb, 1)


def sasrec_block(x, mask, params, *, num_heads, block_b=None,
                 compute_dtype=jnp.float32):
    """x: (B, L, H); mask: (B, 1, L, L); params: 12-tuple (x @ W convention)."""
    wq, wk, wv, wo, g1, be1, w1, b1, w2, b2, g2, be2 = params
    B, L, H = x.shape
    NH = num_heads
    TB = _pick_block_b(B, L) if block_b is None else block_b
    assert B % TB == 0, "block_b must divide batch"

    # Fused QKV weight; fold the 1/sqrt(hidden_units) score scale into Q cols.
    wqkv = jnp.concatenate([wq / math.sqrt(H), wk, wv], axis=1)      # (H, 3H)
    row = lambda p: p.reshape(1, H)
    mask3 = mask.reshape(B, L, L)       # drop singleton head dim outside kernel

    kernel = functools.partial(
        sasrec_block_kernel, num_heads=NH, hidden_units=H, seq_len=L,
        block_b=TB, compute_dtype=compute_dtype)

    full = lambda shp: pl.BlockSpec(shp, lambda b: (0,) * len(shp))
    in_specs = [
        pl.BlockSpec((TB, L, H), lambda b: (b, 0, 0)),       # x
        pl.BlockSpec((TB, L, L), lambda b: (b, 0, 0)),       # mask
        full((H, 3 * H)),                                    # fused W_QKV
        full((H, H)),                                        # W_O
        full((1, H)), full((1, H)),                          # ln1 gamma/beta
        full((H, H)), full((1, H)),                          # W_1, b_1
        full((H, H)), full((1, H)),                          # W_2, b_2
        full((1, H)), full((1, H)),                          # ln2 gamma/beta
    ]
    out_specs = (
        pl.BlockSpec((TB, L, H), lambda b: (b, 0, 0)),
        pl.BlockSpec((TB, NH, L, L), lambda b: (b, 0, 0, 0)),
    )
    out_shape = (
        jax.ShapeDtypeStruct((B, L, H), jnp.float32),
        jax.ShapeDtypeStruct((B, NH, L, L), jnp.float32),
    )
    return pl.pallas_call(
        kernel,
        grid=(B // TB,),
        in_specs=in_specs,
        out_specs=out_specs,
        out_shape=out_shape,
        scratch_shapes=[pltpu.VMEM((TB, L, H), jnp.float32)],   # head-output slab
        compiler_params=pltpu.CompilerParams(dimension_semantics=("parallel",)),
    )(x, mask3, wqkv, wo, row(g1), row(be1), w1, row(b1), w2, row(b2),
      row(g2), row(be2))


def sasrec_block_ref(x, mask, params, *, num_heads):
    """Pure-JAX reference mirroring the PyTorch forward (eval mode)."""
    wq, wk, wv, wo, g1, be1, w1, b1, w2, b2, g2, be2 = params
    B, L, H = x.shape
    dh = H // num_heads

    def split(t):  # (B,L,H) -> (B,nh,L,dh)
        return t.reshape(B, L, num_heads, dh).transpose(0, 2, 1, 3)

    Q, K, V = split(x @ wq), split(x @ wk), split(x @ wv)
    s = jnp.einsum("bhqd,bhkd->bhqk", Q, K) / math.sqrt(H)
    s = jnp.where(mask == 0, -1e9, s)
    p = jax.nn.softmax(s, axis=-1)
    o = jnp.einsum("bhqk,bhkd->bhqd", p, V)
    o = o.transpose(0, 2, 1, 3).reshape(B, L, H)
    o = _layernorm(o @ wo + x, g1, be1)
    h = jnp.maximum(o @ w1 + b1, 0.0)
    out = _layernorm((h @ w2 + b2) + o, g2, be2)
    return out, p


if __name__ == "__main__":
    B, L, H, NH = 2, 8, 32, 4

    key = jax.random.PRNGKey(0)
    keys = jax.random.split(key, 10)

    x = jax.random.normal(keys[0], (B, L, H), dtype=jnp.float32)
    # causal-style mask (B, 1, L, L)
    mask = jnp.tril(jnp.ones((L, L), dtype=jnp.float32))[None, None].repeat(B, axis=0)

    s = 0.05
    params = (
        s * jax.random.normal(keys[1], (H, H), jnp.float32),   # W_Q (x @ W form)
        s * jax.random.normal(keys[2], (H, H), jnp.float32),   # W_K
        s * jax.random.normal(keys[3], (H, H), jnp.float32),   # W_V
        s * jax.random.normal(keys[4], (H, H), jnp.float32),   # W_O
        jnp.ones((H,), jnp.float32),                            # ln1 gamma
        jnp.zeros((H,), jnp.float32),                           # ln1 beta
        s * jax.random.normal(keys[5], (H, H), jnp.float32),   # W_1
        s * jax.random.normal(keys[6], (H,), jnp.float32),     # b_1
        s * jax.random.normal(keys[7], (H, H), jnp.float32),   # W_2
        s * jax.random.normal(keys[8], (H,), jnp.float32),     # b_2
        jnp.ones((H,), jnp.float32),                            # ln2 gamma
        jnp.zeros((H,), jnp.float32),                           # ln2 beta
    )

    out, attn = sasrec_block(x, mask, params, num_heads=NH)
    out, attn = jax.block_until_ready((out, attn))

    out_ref, attn_ref = sasrec_block_ref(x, mask, params, num_heads=NH)
    # Tolerances account for pl.reciprocal(approx=True) in the softmax denom.
    assert jnp.allclose(out, out_ref, atol=2e-3, rtol=1e-3), "output mismatch vs reference"
    assert jnp.allclose(attn, attn_ref, atol=2e-3, rtol=1e-3), "attention mismatch vs reference"

    print("KERNEL_OK")
</pallas_src>

<mosaic_0001>
module attributes {stable_mosaic.version = 11 : i64} {
  func.func @sasrec_block_kernel(%arg0: i32, %arg1: memref<1x8x32xf32, #tpu.memory_space<vmem>>, %arg2: memref<1x8x8xf32, #tpu.memory_space<vmem>>, %arg3: memref<32x96xf32, #tpu.memory_space<vmem>>, %arg4: memref<32x32xf32, #tpu.memory_space<vmem>>, %arg5: memref<1x32xf32, #tpu.memory_space<vmem>>, %arg6: memref<1x32xf32, #tpu.memory_space<vmem>>, %arg7: memref<32x32xf32, #tpu.memory_space<vmem>>, %arg8: memref<1x32xf32, #tpu.memory_space<vmem>>, %arg9: memref<32x32xf32, #tpu.memory_space<vmem>>, %arg10: memref<1x32xf32, #tpu.memory_space<vmem>>, %arg11: memref<1x32xf32, #tpu.memory_space<vmem>>, %arg12: memref<1x32xf32, #tpu.memory_space<vmem>>, %arg13: memref<1x8x32xf32, #tpu.memory_space<vmem>>, %arg14: memref<1x4x8x8xf32, #tpu.memory_space<vmem>>, %arg15: memref<1x8x32xf32, #tpu.memory_space<vmem>>) attributes {dimension_semantics = [#tpu.dimension_semantics<parallel>], iteration_bounds = array<i64: 2>, scalar_prefetch = 0 : i64, scratch_operands = 1 : i64, tpu.core_type = #tpu.core_type<tc>, window_params = [{transform_indices = @transform_0, window_bounds = array<i64: 1, 8, 32>}, {transform_indices = @transform_1, window_bounds = array<i64: 1, 8, 8>}, {pipeline_mode = #tpu.pipeline_mode<synchronous>, transform_indices = @transform_2, window_bounds = array<i64: 32, 96>}, {pipeline_mode = #tpu.pipeline_mode<synchronous>, transform_indices = @transform_3, window_bounds = array<i64: 32, 32>}, {pipeline_mode = #tpu.pipeline_mode<synchronous>, transform_indices = @transform_4, window_bounds = array<i64: 1, 32>}, {pipeline_mode = #tpu.pipeline_mode<synchronous>, transform_indices = @transform_5, window_bounds = array<i64: 1, 32>}, {pipeline_mode = #tpu.pipeline_mode<synchronous>, transform_indices = @transform_6, window_bounds = array<i64: 32, 32>}, {pipeline_mode = #tpu.pipeline_mode<synchronous>, transform_indices = @transform_7, window_bounds = array<i64: 1, 32>}, {pipeline_mode = #tpu.pipeline_mode<synchronous>, transform_indices = @transform_8, window_bounds = array<i64: 32, 32>}, {pipeline_mode = #tpu.pipeline_mode<synchronous>, transform_indices = @transform_9, window_bounds = array<i64: 1, 32>}, {pipeline_mode = #tpu.pipeline_mode<synchronous>, transform_indices = @transform_10, window_bounds = array<i64: 1, 32>}, {pipeline_mode = #tpu.pipeline_mode<synchronous>, transform_indices = @transform_11, window_bounds = array<i64: 1, 32>}, {transform_indices = @transform_12, window_bounds = array<i64: 1, 8, 32>}, {transform_indices = @transform_13, window_bounds = array<i64: 1, 4, 8, 8>}]} {
    %c0 = arith.constant 0 : index
    %c0_0 = arith.constant 0 : index
    %c0_1 = arith.constant 0 : index
    %0 = vector.load %arg1[%c0, %c0_0, %c0_1] : memref<1x8x32xf32, #tpu.memory_space<vmem>>, vector<1x8x32xf32>
    %1 = vector.shape_cast %0 : vector<1x8x32xf32> to vector<8x32xf32>
    %c0_2 = arith.constant 0 : index
    %c0_3 = arith.constant 0 : index
    %c0_4 = arith.constant 0 : index
    %2 = vector.load %arg2[%c0_2, %c0_3, %c0_4] : memref<1x8x8xf32, #tpu.memory_space<vmem>>, vector<1x8x8xf32>
    %cst = arith.constant 0.000000e+00 : f32
    %3 = vector.broadcast %cst : f32 to vector<1x8x8xf32>
    %4 = arith.cmpf oeq, %2, %3 : vector<1x8x8xf32>
    %c0_5 = arith.constant 0 : index
    %c0_6 = arith.constant 0 : index
    %5 = vector.load %arg3[%c0_5, %c0_6] : memref<32x96xf32, #tpu.memory_space<vmem>>, vector<32x96xf32>
    %cst_7 = arith.constant dense<0.000000e+00> : vector<8x96xf32>
    %6 = tpu.matmul %1, %5, %cst_7 {dimension_numbers = #tpu.dot_dimension_numbers<[1], [0], [0], [1], [0, 0, 1, 1], [], []>} : vector<8x32xf32>, vector<32x96xf32>, vector<8x96xf32> -> vector<8x96xf32>
    %7 = vector.extract_strided_slice %6 {offsets = [0, 0], sizes = [8, 32], strides = [1, 1]} : vector<8x96xf32> to vector<8x32xf32>
    %8 = vector.shape_cast %7 : vector<8x32xf32> to vector<1x8x32xf32>
    %9 = vector.extract_strided_slice %6 {offsets = [0, 32], sizes = [8, 32], strides = [1, 1]} : vector<8x96xf32> to vector<8x32xf32>
    %10 = vector.shape_cast %9 : vector<8x32xf32> to vector<1x8x32xf32>
    %11 = vector.extract_strided_slice %6 {offsets = [0, 64], sizes = [8, 32], strides = [1, 1]} : vector<8x96xf32> to vector<8x32xf32>
    %12 = vector.shape_cast %11 : vector<8x32xf32> to vector<1x8x32xf32>
    %13 = vector.extract_strided_slice %8 {offsets = [0, 0, 0], sizes = [1, 8, 8], strides = [1, 1, 1]} : vector<1x8x32xf32> to vector<1x8x8xf32>
    %14 = vector.extract_strided_slice %10 {offsets = [0, 0, 0], sizes = [1, 8, 8], strides = [1, 1, 1]} : vector<1x8x32xf32> to vector<1x8x8xf32>
    %15 = vector.extract_strided_slice %12 {offsets = [0, 0, 0], sizes = [1, 8, 8], strides = [1, 1, 1]} : vector<1x8x32xf32> to vector<1x8x8xf32>
    "tpu.trace_start"() <{level = 10 : i32, message = "bqd,bkd->bqk"}> : () -> ()
    %cst_8 = arith.constant dense<0.000000e+00> : vector<1x8x8xf32>
    %16 = tpu.matmul %13, %14, %cst_8 {dimension_numbers = #tpu.dot_dimension_numbers<[2], [2], [1], [1], [0, 0, 0, 1, 1, 1], [0], [0]>} : vector<1x8x8xf32>, vector<1x8x8xf32>, vector<1x8x8xf32> -> vector<1x8x8xf32>
    %cst_9 = arith.constant -1.000000e+09 : f32
    "tpu.trace_stop"() : () -> ()
    %17 = vector.broadcast %cst_9 : f32 to vector<1x8x8xf32>
    %18 = arith.select %4, %17, %16 : vector<1x8x8xi1>, vector<1x8x8xf32>
    %cst_10 = arith.constant dense<0xFF800000> : vector<1x8xf32>
    %19 = vector.multi_reduction <maximumf>, %18, %cst_10 [2] : vector<1x8x8xf32> to vector<1x8xf32>
    %20 = vector.shape_cast %19 : vector<1x8xf32> to vector<1x8x1xf32>
    %21 = vector.broadcast %20 : vector<1x8x1xf32> to vector<1x8x8xf32>
    %22 = arith.subf %18, %21 : vector<1x8x8xf32>
    %23 = math.exp %22 : vector<1x8x8xf32>
    %cst_11 = arith.constant dense<0.000000e+00> : vector<1x8xf32>
    %24 = vector.multi_reduction <add>, %23, %cst_11 [2] : vector<1x8x8xf32> to vector<1x8xf32>
    %25 = vector.shape_cast %24 : vector<1x8xf32> to vector<1x8x1xf32>
    %26 = tpu.reciprocal %25 {approx = true} : vector<1x8x1xf32> -> vector<1x8x1xf32>
    %27 = vector.broadcast %26 : vector<1x8x1xf32> to vector<1x8x8xf32>
    %28 = arith.mulf %23, %27 : vector<1x8x8xf32>
    %c0_12 = arith.constant 0 : index
    %c0_13 = arith.constant 0 : index
    %c0_14 = arith.constant 0 : index
    %c0_15 = arith.constant 0 : index
    %29 = vector.load %arg14[%c0_12, %c0_13, %c0_14, %c0_15] : memref<1x4x8x8xf32, #tpu.memory_space<vmem>>, vector<1x1x8x8xf32>
    %30 = vector.shape_cast %29 : vector<1x1x8x8xf32> to vector<1x8x8xf32>
    %31 = vector.shape_cast %28 : vector<1x8x8xf32> to vector<1x1x8x8xf32>
    tpu.vector_store %arg14[%c0_12, %c0_13, %c0_14, %c0_15], %31 {strides = array<i32>} : memref<1x4x8x8xf32, #tpu.memory_space<vmem>>, vector<1x1x8x8xf32>,
    "tpu.trace_start"() <{level = 10 : i32, message = "bqk,bkd->bqd"}> : () -> ()
    %cst_16 = arith.constant dense<0.000000e+00> : vector<1x8x8xf32>
    %32 = tpu.matmul %28, %15, %cst_16 {dimension_numbers = #tpu.dot_dimension_numbers<[2], [1], [1], [2], [0, 0, 0, 1, 1, 2], [0], [0]>} : vector<1x8x8xf32>, vector<1x8x8xf32>, vector<1x8x8xf32> -> vector<1x8x8xf32>
    "tpu.trace_stop"() : () -> ()
    %c0_17 = arith.constant 0 : index
    %c0_18 = arith.constant 0 : index
    %c0_19 = arith.constant 0 : index
    %33 = vector.load %arg15[%c0_17, %c0_18, %c0_19] : memref<1x8x32xf32, #tpu.memory_space<vmem>>, vector<1x8x8xf32>
    tpu.vector_store %arg15[%c0_17, %c0_18, %c0_19], %32 {strides = array<i32>} : memref<1x8x32xf32, #tpu.memory_space<vmem>>, vector<1x8x8xf32>,
    %34 = vector.extract_strided_slice %8 {offsets = [0, 0, 8], sizes = [1, 8, 8], strides = [1, 1, 1]} : vector<1x8x32xf32> to vector<1x8x8xf32>
    %35 = vector.extract_strided_slice %10 {offsets = [0, 0, 8], sizes = [1, 8, 8], strides = [1, 1, 1]} : vector<1x8x32xf32> to vector<1x8x8xf32>
    %36 = vector.extract_strided_slice %12 {offsets = [0, 0, 8], sizes = [1, 8, 8], strides = [1, 1, 1]} : vector<1x8x32xf32> to vector<1x8x8xf32>
    "tpu.trace_start"() <{level = 10 : i32, message = "bqd,bkd->bqk"}> : () -> ()
    %cst_20 = arith.constant dense<0.000000e+00> : vector<1x8x8xf32>
    %37 = tpu.matmul %34, %35, %cst_20 {dimension_numbers = #tpu.dot_dimension_numbers<[2], [2], [1], [1], [0, 0, 0, 1, 1, 1], [0], [0]>} : vector<1x8x8xf32>, vector<1x8x8xf32>, vector<1x8x8xf32> -> vector<1x8x8xf32>
    %cst_21 = arith.constant -1.000000e+09 : f32
    "tpu.trace_stop"() : () -> ()
    %38 = vector.broadcast %cst_21 : f32 to vector<1x8x8xf32>
    %39 = arith.select %4, %38, %37 : vector<1x8x8xi1>, vector<1x8x8xf32>
    %cst_22 = arith.constant dense<0xFF800000> : vector<1x8xf32>
    %40 = vector.multi_reduction <maximumf>, %39, %cst_22 [2] : vector<1x8x8xf32> to vector<1x8xf32>
    %41 = vector.shape_cast %40 : vector<1x8xf32> to vector<1x8x1xf32>
    %42 = vector.broadcast %41 : vector<1x8x1xf32> to vector<1x8x8xf32>
    %43 = arith.subf %39, %42 : vector<1x8x8xf32>
    %44 = math.exp %43 : vector<1x8x8xf32>
    %cst_23 = arith.constant dense<0.000000e+00> : vector<1x8xf32>
    %45 = vector.multi_reduction <add>, %44, %cst_23 [2] : vector<1x8x8xf32> to vector<1x8xf32>
    %46 = vector.shape_cast %45 : vector<1x8xf32> to vector<1x8x1xf32>
    %47 = tpu.reciprocal %46 {approx = true} : vector<1x8x1xf32> -> vector<1x8x1xf32>
    %48 = vector.broadcast %47 : vector<1x8x1xf32> to vector<1x8x8xf32>
    %49 = arith.mulf %44, %48 : vector<1x8x8xf32>
    %c0_24 = arith.constant 0 : index
    %c1 = arith.constant 1 : index
    %c0_25 = arith.constant 0 : index
    %c0_26 = arith.constant 0 : index
    %50 = vector.load %arg14[%c0_24, %c1, %c0_25, %c0_26] : memref<1x4x8x8xf32, #tpu.memory_space<vmem>>, vector<1x1x8x8xf32>
    %51 = vector.shape_cast %50 : vector<1x1x8x8xf32> to vector<1x8x8xf32>
    %52 = vector.shape_cast %49 : vector<1x8x8xf32> to vector<1x1x8x8xf32>
    tpu.vector_store %arg14[%c0_24, %c1, %c0_25, %c0_26], %52 {strides = array<i32>} : memref<1x4x8x8xf32, #tpu.memory_space<vmem>>, vector<1x1x8x8xf32>,
    "tpu.trace_start"() <{level = 10 : i32, message = "bqk,bkd->bqd"}> : () -> ()
    %cst_27 = arith.constant dense<0.000000e+00> : vector<1x8x8xf32>
    %53 = tpu.matmul %49, %36, %cst_27 {dimension_numbers = #tpu.dot_dimension_numbers<[2], [1], [1], [2], [0, 0, 0, 1, 1, 2], [0], [0]>} : vector<1x8x8xf32>, vector<1x8x8xf32>, vector<1x8x8xf32> -> vector<1x8x8xf32>
    "tpu.trace_stop"() : () -> ()
    %c0_28 = arith.constant 0 : index
    %c0_29 = arith.constant 0 : index
    %c8 = arith.constant 8 : index
    %54 = vector.load %arg15[%c0_28, %c0_29, %c8] : memref<1x8x32xf32, #tpu.memory_space<vmem>>, vector<1x8x8xf32>
    tpu.vector_store %arg15[%c0_28, %c0_29, %c8], %53 {strides = array<i32>} : memref<1x8x32xf32, #tpu.memory_space<vmem>>, vector<1x8x8xf32>,
    %55 = vector.extract_strided_slice %8 {offsets = [0, 0, 16], sizes = [1, 8, 8], strides = [1, 1, 1]} : vector<1x8x32xf32> to vector<1x8x8xf32>
    %56 = vector.extract_strided_slice %10 {offsets = [0, 0, 16], sizes = [1, 8, 8], strides = [1, 1, 1]} : vector<1x8x32xf32> to vector<1x8x8xf32>
    %57 = vector.extract_strided_slice %12 {offsets = [0, 0, 16], sizes = [1, 8, 8], strides = [1, 1, 1]} : vector<1x8x32xf32> to vector<1x8x8xf32>
    "tpu.trace_start"() <{level = 10 : i32, message = "bqd,bkd->bqk"}> : () -> ()
    %cst_30 = arith.constant dense<0.000000e+00> : vector<1x8x8xf32>
    %58 = tpu.matmul %55, %56, %cst_30 {dimension_numbers = #tpu.dot_dimension_numbers<[2], [2], [1], [1], [0, 0, 0, 1, 1, 1], [0], [0]>} : vector<1x8x8xf32>, vector<1x8x8xf32>, vector<1x8x8xf32> -> vector<1x8x8xf32>
    %cst_31 = arith.constant -1.000000e+09 : f32
    "tpu.trace_stop"() : () -> ()
    %59 = vector.broadcast %cst_31 : f32 to vector<1x8x8xf32>
    %60 = arith.select %4, %59, %58 : vector<1x8x8xi1>, vector<1x8x8xf32>
    %cst_32 = arith.constant dense<0xFF800000> : vector<1x8xf32>
    %61 = vector.multi_reduction <maximumf>, %60, %cst_32 [2] : vector<1x8x8xf32> to vector<1x8xf32>
    %62 = vector.shape_cast %61 : vector<1x8xf32> to vector<1x8x1xf32>
    %63 = vector.broadcast %62 : vector<1x8x1xf32> to vector<1x8x8xf32>
    %64 = arith.subf %60, %63 : vector<1x8x8xf32>
    %65 = math.exp %64 : vector<1x8x8xf32>
    %cst_33 = arith.constant dense<0.000000e+00> : vector<1x8xf32>
    %66 = vector.multi_reduction <add>, %65, %cst_33 [2] : vector<1x8x8xf32> to vector<1x8xf32>
    %67 = vector.shape_cast %66 : vector<1x8xf32> to vector<1x8x1xf32>
    %68 = tpu.reciprocal %67 {approx = true} : vector<1x8x1xf32> -> vector<1x8x1xf32>
    %69 = vector.broadcast %68 : vector<1x8x1xf32> to vector<1x8x8xf32>
    %70 = arith.mulf %65, %69 : vector<1x8x8xf32>
    %c0_34 = arith.constant 0 : index
    %c2 = arith.constant 2 : index
    %c0_35 = arith.constant 0 : index
    %c0_36 = arith.constant 0 : index
    %71 = vector.load %arg14[%c0_34, %c2, %c0_35, %c0_36] : memref<1x4x8x8xf32, #tpu.memory_space<vmem>>, vector<1x1x8x8xf32>
    %72 = vector.shape_cast %71 : vector<1x1x8x8xf32> to vector<1x8x8xf32>
    %73 = vector.shape_cast %70 : vector<1x8x8xf32> to vector<1x1x8x8xf32>
    tpu.vector_store %arg14[%c0_34, %c2, %c0_35, %c0_36], %73 {strides = array<i32>} : memref<1x4x8x8xf32, #tpu.memory_space<vmem>>, vector<1x1x8x8xf32>,
    "tpu.trace_start"() <{level = 10 : i32, message = "bqk,bkd->bqd"}> : () -> ()
    %cst_37 = arith.constant dense<0.000000e+00> : vector<1x8x8xf32>
    %74 = tpu.matmul %70, %57, %cst_37 {dimension_numbers = #tpu.dot_dimension_numbers<[2], [1], [1], [2], [0, 0, 0, 1, 1, 2], [0], [0]>} : vector<1x8x8xf32>, vector<1x8x8xf32>, vector<1x8x8xf32> -> vector<1x8x8xf32>
    "tpu.trace_stop"() : () -> ()
    %c0_38 = arith.constant 0 : index
    %c0_39 = arith.constant 0 : index
    %c16 = arith.constant 16 : index
    %75 = vector.load %arg15[%c0_38, %c0_39, %c16] : memref<1x8x32xf32, #tpu.memory_space<vmem>>, vector<1x8x8xf32>
    tpu.vector_store %arg15[%c0_38, %c0_39, %c16], %74 {strides = array<i32>} : memref<1x8x32xf32, #tpu.memory_space<vmem>>, vector<1x8x8xf32>,
    %76 = vector.extract_strided_slice %8 {offsets = [0, 0, 24], sizes = [1, 8, 8], strides = [1, 1, 1]} : vector<1x8x32xf32> to vector<1x8x8xf32>
    %77 = vector.extract_strided_slice %10 {offsets = [0, 0, 24], sizes = [1, 8, 8], strides = [1, 1, 1]} : vector<1x8x32xf32> to vector<1x8x8xf32>
    %78 = vector.extract_strided_slice %12 {offsets = [0, 0, 24], sizes = [1, 8, 8], strides = [1, 1, 1]} : vector<1x8x32xf32> to vector<1x8x8xf32>
    "tpu.trace_start"() <{level = 10 : i32, message = "bqd,bkd->bqk"}> : () -> ()
    %cst_40 = arith.constant dense<0.000000e+00> : vector<1x8x8xf32>
    %79 = tpu.matmul %76, %77, %cst_40 {dimension_numbers = #tpu.dot_dimension_numbers<[2], [2], [1], [1], [0, 0, 0, 1, 1, 1], [0], [0]>} : vector<1x8x8xf32>, vector<1x8x8xf32>, vector<1x8x8xf32> -> vector<1x8x8xf32>
    %cst_41 = arith.constant -1.000000e+09 : f32
    "tpu.trace_stop"() : () -> ()
    %80 = vector.broadcast %cst_41 : f32 to vector<1x8x8xf32>
    %81 = arith.select %4, %80, %79 : vector<1x8x8xi1>, vector<1x8x8xf32>
    %cst_42 = arith.constant dense<0xFF800000> : vector<1x8xf32>
    %82 = vector.multi_reduction <maximumf>, %81, %cst_42 [2] : vector<1x8x8xf32> to vector<1x8xf32>
    %83 = vector.shape_cast %82 : vector<1x8xf32> to vector<1x8x1xf32>
    %84 = vector.broadcast %83 : vector<1x8x1xf32> to vector<1x8x8xf32>
    %85 = arith.subf %81, %84 : vector<1x8x8xf32>
    %86 = math.exp %85 : vector<1x8x8xf32>
    %cst_43 = arith.constant dense<0.000000e+00> : vector<1x8xf32>
    %87 = vector.multi_reduction <add>, %86, %cst_43 [2] : vector<1x8x8xf32> to vector<1x8xf32>
    %88 = vector.shape_cast %87 : vector<1x8xf32> to vector<1x8x1xf32>
    %89 = tpu.reciprocal %88 {approx = true} : vector<1x8x1xf32> -> vector<1x8x1xf32>
    %90 = vector.broadcast %89 : vector<1x8x1xf32> to vector<1x8x8xf32>
    %91 = arith.mulf %86, %90 : vector<1x8x8xf32>
    %c0_44 = arith.constant 0 : index
    %c3 = arith.constant 3 : index
    %c0_45 = arith.constant 0 : index
    %c0_46 = arith.constant 0 : index
    %92 = vector.load %arg14[%c0_44, %c3, %c0_45, %c0_46] : memref<1x4x8x8xf32, #tpu.memory_space<vmem>>, vector<1x1x8x8xf32>
    %93 = vector.shape_cast %92 : vector<1x1x8x8xf32> to vector<1x8x8xf32>
    %94 = vector.shape_cast %91 : vector<1x8x8xf32> to vector<1x1x8x8xf32>
    tpu.vector_store %arg14[%c0_44, %c3, %c0_45, %c0_46], %94 {strides = array<i32>} : memref<1x4x8x8xf32, #tpu.memory_space<vmem>>, vector<1x1x8x8xf32>,
    "tpu.trace_start"() <{level = 10 : i32, message = "bqk,bkd->bqd"}> : () -> ()
    %cst_47 = arith.constant dense<0.000000e+00> : vector<1x8x8xf32>
    %95 = tpu.matmul %91, %78, %cst_47 {dimension_numbers = #tpu.dot_dimension_numbers<[2], [1], [1], [2], [0, 0, 0, 1, 1, 2], [0], [0]>} : vector<1x8x8xf32>, vector<1x8x8xf32>, vector<1x8x8xf32> -> vector<1x8x8xf32>
    "tpu.trace_stop"() : () -> ()
    %c0_48 = arith.constant 0 : index
    %c0_49 = arith.constant 0 : index
    %c24 = arith.constant 24 : index
    %96 = vector.load %arg15[%c0_48, %c0_49, %c24] : memref<1x8x32xf32, #tpu.memory_space<vmem>>, vector<1x8x8xf32>
    tpu.vector_store %arg15[%c0_48, %c0_49, %c24], %95 {strides = array<i32>} : memref<1x8x32xf32, #tpu.memory_space<vmem>>, vector<1x8x8xf32>,
    %c0_50 = arith.constant 0 : index
    %c0_51 = arith.constant 0 : index
    %c0_52 = arith.constant 0 : index
    %97 = vector.load %arg15[%c0_50, %c0_51, %c0_52] : memref<1x8x32xf32, #tpu.memory_space<vmem>>, vector<1x8x32xf32>
    %98 = vector.shape_cast %97 : vector<1x8x32xf32> to vector<8x32xf32>
    %c0_53 = arith.constant 0 : index
    %c0_54 = arith.constant 0 : index
    %99 = vector.load %arg4[%c0_53, %c0_54] : memref<32x32xf32, #tpu.memory_space<vmem>>, vector<32x32xf32>
    %cst_55 = arith.constant dense<0.000000e+00> : vector<8x32xf32>
    %100 = tpu.matmul %98, %99, %cst_55 {dimension_numbers = #tpu.dot_dimension_numbers<[1], [0], [0], [1], [0, 0, 1, 1], [], []>} : vector<8x32xf32>, vector<32x32xf32>, vector<8x32xf32> -> vector<8x32xf32>
    %101 = arith.addf %100, %1 : vector<8x32xf32>
    %c0_56 = arith.constant 0 : index
    %c0_57 = arith.constant 0 : index
    %102 = vector.load %arg5[%c0_56, %c0_57] : memref<1x32xf32, #tpu.memory_space<vmem>>, vector<1x32xf32>
    %c0_58 = arith.constant 0 : index
    %c0_59 = arith.constant 0 : index
    %103 = vector.load %arg6[%c0_58, %c0_59] : memref<1x32xf32, #tpu.memory_space<vmem>>, vector<1x32xf32>
    %cst_60 = arith.constant dense<0.000000e+00> : vector<8xf32>
    %104 = vector.multi_reduction <add>, %101, %cst_60 [1] : vector<8x32xf32> to vector<8xf32>
    %105 = vector.shape_cast %104 : vector<8xf32> to vector<8x1xf32>
    %cst_61 = arith.constant 3.200000e+01 : f32
    %106 = vector.broadcast %cst_61 : f32 to vector<8x1xf32>
    %107 = arith.divf %105, %106 : vector<8x1xf32>
    %108 = vector.broadcast %107 : vector<8x1xf32> to vector<8x32xf32>
    %109 = arith.subf %101, %108 : vector<8x32xf32>
    %110 = arith.mulf %109, %109 : vector<8x32xf32>
    %cst_62 = arith.constant dense<0.000000e+00> : vector<8xf32>
    %111 = vector.multi_reduction <add>, %110, %cst_62 [1] : vector<8x32xf32> to vector<8xf32>
    %112 = vector.shape_cast %111 : vector<8xf32> to vector<8x1xf32>
    %cst_63 = arith.constant 3.200000e+01 : f32
    %113 = vector.broadcast %cst_63 : f32 to vector<8x1xf32>
    %114 = arith.divf %112, %113 : vector<8x1xf32>
    %115 = vector.broadcast %107 : vector<8x1xf32> to vector<8x32xf32>
    %116 = arith.subf %101, %115 : vector<8x32xf32>
    %cst_64 = arith.constant 9.99999997E-7 : f32
    %117 = vector.broadcast %cst_64 : f32 to vector<8x1xf32>
    %118 = arith.addf %114, %117 : vector<8x1xf32>
    %119 = math.rsqrt %118 : vector<8x1xf32>
    %120 = vector.broadcast %119 : vector<8x1xf32> to vector<8x32xf32>
    %121 = arith.mulf %116, %120 : vector<8x32xf32>
    %122 = vector.broadcast %102 : vector<1x32xf32> to vector<8x32xf32>
    %123 = arith.mulf %121, %122 : vector<8x32xf32>
    %124 = vector.broadcast %103 : vector<1x32xf32> to vector<8x32xf32>
    %125 = arith.addf %123, %124 : vector<8x32xf32>
    %c0_65 = arith.constant 0 : index
    %c0_66 = arith.constant 0 : index
    %126 = vector.load %arg7[%c0_65, %c0_66] : memref<32x32xf32, #tpu.memory_space<vmem>>, vector<32x32xf32>
    %cst_67 = arith.constant dense<0.000000e+00> : vector<8x32xf32>
    %127 = tpu.matmul %125, %126, %cst_67 {dimension_numbers = #tpu.dot_dimension_numbers<[1], [0], [0], [1], [0, 0, 1, 1], [], []>} : vector<8x32xf32>, vector<32x32xf32>, vector<8x32xf32> -> vector<8x32xf32>
    %c0_68 = arith.constant 0 : index
    %c0_69 = arith.constant 0 : index
    %128 = vector.load %arg8[%c0_68, %c0_69] : memref<1x32xf32, #tpu.memory_space<vmem>>, vector<1x32xf32>
    %129 = vector.broadcast %128 : vector<1x32xf32> to vector<8x32xf32>
    %130 = arith.addf %127, %129 : vector<8x32xf32>
    %cst_70 = arith.constant 0.000000e+00 : f32
    %131 = vector.broadcast %cst_70 : f32 to vector<8x32xf32>
    %132 = arith.maximumf %130, %131 : vector<8x32xf32>
    %c0_71 = arith.constant 0 : index
    %c0_72 = arith.constant 0 : index
    %133 = vector.load %arg9[%c0_71, %c0_72] : memref<32x32xf32, #tpu.memory_space<vmem>>, vector<32x32xf32>
    %cst_73 = arith.constant dense<0.000000e+00> : vector<8x32xf32>
    %134 = tpu.matmul %132, %133, %cst_73 {dimension_numbers = #tpu.dot_dimension_numbers<[1], [0], [0], [1], [0, 0, 1, 1], [], []>} : vector<8x32xf32>, vector<32x32xf32>, vector<8x32xf32> -> vector<8x32xf32>
    %c0_74 = arith.constant 0 : index
    %c0_75 = arith.constant 0 : index
    %135 = vector.load %arg10[%c0_74, %c0_75] : memref<1x32xf32, #tpu.memory_space<vmem>>, vector<1x32xf32>
    %136 = vector.broadcast %135 : vector<1x32xf32> to vector<8x32xf32>
    %137 = arith.addf %134, %136 : vector<8x32xf32>
    %138 = arith.addf %137, %125 : vector<8x32xf32>
    %c0_76 = arith.constant 0 : index
    %c0_77 = arith.constant 0 : index
    %139 = vector.load %arg11[%c0_76, %c0_77] : memref<1x32xf32, #tpu.memory_space<vmem>>, vector<1x32xf32>
    %c0_78 = arith.constant 0 : index
    %c0_79 = arith.constant 0 : index
    %140 = vector.load %arg12[%c0_78, %c0_79] : memref<1x32xf32, #tpu.memory_space<vmem>>, vector<1x32xf32>
    %cst_80 = arith.constant dense<0.000000e+00> : vector<8xf32>
    %141 = vector.multi_reduction <add>, %138, %cst_80 [1] : vector<8x32xf32> to vector<8xf32>
    %142 = vector.shape_cast %141 : vector<8xf32> to vector<8x1xf32>
    %cst_81 = arith.constant 3.200000e+01 : f32
    %143 = vector.broadcast %cst_81 : f32 to vector<8x1xf32>
    %144 = arith.divf %142, %143 : vector<8x1xf32>
    %145 = vector.broadcast %144 : vector<8x1xf32> to vector<8x32xf32>
    %146 = arith.subf %138, %145 : vector<8x32xf32>
    %147 = arith.mulf %146, %146 : vector<8x32xf32>
    %cst_82 = arith.constant dense<0.000000e+00> : vector<8xf32>
    %148 = vector.multi_reduction <add>, %147, %cst_82 [1] : vector<8x32xf32> to vector<8xf32>
    %149 = vector.shape_cast %148 : vector<8xf32> to vector<8x1xf32>
    %cst_83 = arith.constant 3.200000e+01 : f32
    %150 = vector.broadcast %cst_83 : f32 to vector<8x1xf32>
    %151 = arith.divf %149, %150 : vector<8x1xf32>
    %152 = vector.broadcast %144 : vector<8x1xf32> to vector<8x32xf32>
    %153 = arith.subf %138, %152 : vector<8x32xf32>
    %cst_84 = arith.constant 9.99999997E-7 : f32
    %154 = vector.broadcast %cst_84 : f32 to vector<8x1xf32>
    %155 = arith.addf %151, %154 : vector<8x1xf32>
    %156 = math.rsqrt %155 : vector<8x1xf32>
    %157 = vector.broadcast %156 : vector<8x1xf32> to vector<8x32xf32>
    %158 = arith.mulf %153, %157 : vector<8x32xf32>
    %159 = vector.broadcast %139 : vector<1x32xf32> to vector<8x32xf32>
    %160 = arith.mulf %158, %159 : vector<8x32xf32>
    %161 = vector.broadcast %140 : vector<1x32xf32> to vector<8x32xf32>
    %162 = arith.addf %160, %161 : vector<8x32xf32>
    %163 = vector.shape_cast %162 : vector<8x32xf32> to vector<1x8x32xf32>
    %c0_85 = arith.constant 0 : index
    %c0_86 = arith.constant 0 : index
    %c0_87 = arith.constant 0 : index
    %164 = vector.load %arg13[%c0_85, %c0_86, %c0_87] : memref<1x8x32xf32, #tpu.memory_space<vmem>>, vector<1x8x32xf32>
    tpu.vector_store %arg13[%c0_85, %c0_86, %c0_87], %163 {strides = array<i32>} : memref<1x8x32xf32, #tpu.memory_space<vmem>>, vector<1x8x32xf32>,
    return
  }
  func.func @transform_0(%arg0: i32) -> (i32, i32, i32) {
    %c0_i32 = arith.constant 0 : i32
    %c0_i32_0 = arith.constant 0 : i32
    %c0_i32_1 = arith.constant 0 : i32
    return %arg0, %c0_i32, %c0_i32_0 : i32, i32, i32
  }
  func.func @transform_1(%arg0: i32) -> (i32, i32, i32) {
    %c0_i32 = arith.constant 0 : i32
    %c0_i32_0 = arith.constant 0 : i32
    %c0_i32_1 = arith.constant 0 : i32
    return %arg0, %c0_i32, %c0_i32_0 : i32, i32, i32
  }
  func.func @transform_2(%arg0: i32) -> (i32, i32) {
    %c0_i32 = arith.constant 0 : i32
    %c0_i32_0 = arith.constant 0 : i32
    %c0_i32_1 = arith.constant 0 : i32
    return %c0_i32, %c0_i32_0 : i32, i32
  }
  func.func @transform_3(%arg0: i32) -> (i32, i32) {
    %c0_i32 = arith.constant 0 : i32
    %c0_i32_0 = arith.constant 0 : i32
    %c0_i32_1 = arith.constant 0 : i32
    return %c0_i32, %c0_i32_0 : i32, i32
  }
  func.func @transform_4(%arg0: i32) -> (i32, i32) {
    %c0_i32 = arith.constant 0 : i32
    %c0_i32_0 = arith.constant 0 : i32
    %c0_i32_1 = arith.constant 0 : i32
    return %c0_i32, %c0_i32_0 : i32, i32
  }
  func.func @transform_5(%arg0: i32) -> (i32, i32) {
    %c0_i32 = arith.constant 0 : i32
    %c0_i32_0 = arith.constant 0 : i32
    %c0_i32_1 = arith.constant 0 : i32
    return %c0_i32, %c0_i32_0 : i32, i32
  }
  func.func @transform_6(%arg0: i32) -> (i32, i32) {
    %c0_i32 = arith.constant 0 : i32
    %c0_i32_0 = arith.constant 0 : i32
    %c0_i32_1 = arith.constant 0 : i32
    return %c0_i32, %c0_i32_0 : i32, i32
  }
  func.func @transform_7(%arg0: i32) -> (i32, i32) {
    %c0_i32 = arith.constant 0 : i32
    %c0_i32_0 = arith.constant 0 : i32
    %c0_i32_1 = arith.constant 0 : i32
    return %c0_i32, %c0_i32_0 : i32, i32
  }
  func.func @transform_8(%arg0: i32) -> (i32, i32) {
    %c0_i32 = arith.constant 0 : i32
    %c0_i32_0 = arith.constant 0 : i32
    %c0_i32_1 = arith.constant 0 : i32
    return %c0_i32, %c0_i32_0 : i32, i32
  }
  func.func @transform_9(%arg0: i32) -> (i32, i32) {
    %c0_i32 = arith.constant 0 : i32
    %c0_i32_0 = arith.constant 0 : i32
    %c0_i32_1 = arith.constant 0 : i32
    return %c0_i32, %c0_i32_0 : i32, i32
  }
  func.func @transform_10(%arg0: i32) -> (i32, i32) {
    %c0_i32 = arith.constant 0 : i32
    %c0_i32_0 = arith.constant 0 : i32
    %c0_i32_1 = arith.constant 0 : i32
    return %c0_i32, %c0_i32_0 : i32, i32
  }
  func.func @transform_11(%arg0: i32) -> (i32, i32) {
    %c0_i32 = arith.constant 0 : i32
    %c0_i32_0 = arith.constant 0 : i32
    %c0_i32_1 = arith.constant 0 : i32
    return %c0_i32, %c0_i32_0 : i32, i32
  }
  func.func @transform_12(%arg0: i32) -> (i32, i32, i32) {
    %c0_i32 = arith.constant 0 : i32
    %c0_i32_0 = arith.constant 0 : i32
    %c0_i32_1 = arith.constant 0 : i32
    return %arg0, %c0_i32, %c0_i32_0 : i32, i32, i32
  }
  func.func @transform_13(%arg0: i32) -> (i32, i32, i32, i32) {
    %c0_i32 = arith.constant 0 : i32
    %c0_i32_0 = arith.constant 0 : i32
    %c0_i32_1 = arith.constant 0 : i32
    %c0_i32_2 = arith.constant 0 : i32
    return %arg0, %c0_i32, %c0_i32_0, %c0_i32_1 : i32, i32, i32, i32
  }
}

</mosaic_0001>

<bundles_post_ra>
// kernel: tpu_custom_call.1
= control target key start
LH: loop header
LB: loop body
LE: loop exit
PB: predicated region body
PF: predicated region fallthrough
CT: control target
= control target key end

     0   :  { %s2145_s0 = inlined_call_operand.hbm [shape: f32[2,8,32], index: 0, kind: input, shape index: {}]   ;;  %s2146_s1 = inlined_call_operand.hbm [shape: f32[2,8,8], index: 1, kind: input, shape index: {}]   ;;  %s2147_s2 = inlined_call_operand.hbm [shape: f32[32,96], index: 2, kind: input, shape index: {}]   ;;  %s2148_s3 = inlined_call_operand.hbm [shape: f32[32,32], index: 3, kind: input, shape index: {}]   ;;  %s2149_s4 = inlined_call_operand.vmem [shape: f32[1,32], index: 4, kind: input, shape index: {}]   ;;  %s2150_s5 = inlined_call_operand.vmem [shape: f32[1,32], index: 5, kind: input, shape index: {}]   ;;  %s2151_s6 = inlined_call_operand.hbm [shape: f32[32,32], index: 6, kind: input, shape index: {}]   ;;  %s2152_s7 = inlined_call_operand.vmem [shape: f32[1,32], index: 7, kind: input, shape index: {}]   ;;  %s2153_s8 = inlined_call_operand.hbm [shape: f32[32,32], index: 8, kind: input, shape index: {}]   ;;  %s2154_s9 = inlined_call_operand.vmem [shape: f32[1,32], index: 9, kind: input, shape index: {}]   ;;  %s2155_s10 = inlined_call_operand.vmem [shape: f32[1,32], index: 10, kind: input, shape index: {}]   ;;  %s2156_s11 = inlined_call_operand.vmem [shape: f32[1,32], index: 11, kind: input, shape index: {}]   ;;  %s2157_s12 = inlined_call_operand.hbm [shape: f32[2,8,32], index: 12, kind: output, shape index: {0}]   ;;  %s2158_s13 = inlined_call_operand.hbm [shape: f32[2,4,8,8], index: 13, kind: output, shape index: {1}]  }
   0x1   :  { %2166 = sst [smem:[#allocation30_spill]] %s2147_s2 }
   0x2   :  { %2167 = sst [smem:[#allocation31_spill]] %s2148_s3 }
   0x3   :  { %2168 = sst [smem:[#allocation32_spill]] %s2151_s6 }
   0x4   :  { %2169 = sst [smem:[#allocation33_spill]] %s2153_s8 }
   0x5   :  { %2170 = sst [smem:[#allocation34_spill]] %s2156_s11 }
   0x6   :  { %2171 = sst [smem:[#allocation35_spill]] %s2157_s12 }
   0x7   :  { %19 = vsyncpa [#allocation4], 0 }
   0x8   :  { %21 = vsyncpa [#allocation4 + $0x1], 0 }
   0x9   :  { %22 = vsyncpa [#allocation7], 0 }
   0xa   :  { %24 = vsyncpa [#allocation7 + $0x1], 0 }
   0xb   :  { %25 = vsyncpa [#allocation10], 0 }
   0xc   :  { %26 = vsyncpa [#allocation13], 0 }
   0xd   :  { %27 = vsyncpa [#allocation5], 0 }
   0xe   :  { %29 = vsyncpa [#allocation5 + $0x1], 0 }
   0xf   :  { %30 = vsyncpa [#allocation16], 0 }
  0x10   :  { %32 = vsyncpa [#allocation16 + $0x1], 0  ;;  %s1839_s25 = smov 0   ;;  %s1841_s26 = smov 0  }
  0x11   :  { %s1843_s27 = smov 0   ;;  %s1845_s28 = smov 0  }
  0x12 LB: > { %2172 = sst [smem:[#allocation24_spill]] %s1733_s25  ;;  %s1863_s15 = sadd.s32 4294967295, %s1745_s28   ;;  %s1745_s28 = sphi %s1845_s28, %s2195_s28   ;;  %s1741_s27 = sphi %s1843_s27, %s2197_s27   ;;  %s1737_s26 = sphi %s1841_s26, %s2199_s26   ;;  %s1733_s25 = sphi %s1839_s25, %s2198_s25  }
  0x13   : > { %2173 = sst [smem:[#allocation25_spill]] %s1741_s27  ;;  %p1262_p0 = scmp.ge.s32.totalorder %s1745_s28, 1 }
  0x14   : > { %2174 = sst [smem:[#allocation26_spill]] %s1745_s28  ;;  %p59_p1 = scmp.eq.s32.totalorder %s1863_s15, 0 }
  0x15   : > { %s2175_s2 = sld [smem:[#allocation30_spill]]  ;;  %p357_p2 = scmp.lt.s32.totalorder %s1745_s28, 3 }
  0x16   : > { %s1747_s17 = smov [#allocation8]   ;;  %s2177_s3 = sld [smem:[#allocation31_spill]] }
  0x17   : > { %p1868_p3 = pnand %p1262_p0, %p357_p2  ;;  %s370_s18 = sshll.u32 %s1747_s17, 4  ;;  %s371_s18 = int_to_ptr.vmem [resolvable:$true] %s370_s18 }
  0x18   : > { %s2179_s6 = sld [smem:[#allocation32_spill]]  ;;  %s1748_s30 = smov [#allocation9]  }
  0x19   : > { %p1332_p4 = pneg %p1868_p3  ;;  %s384_s17 = sshll.u32 %s1748_s30, 4  ;;  %s385_s17 = int_to_ptr.vmem [resolvable:$true] %s384_s17 }
  0x1a   : > { %s1750_s19 = smov 8   ;;  %s2180_s8 = sld [smem:[#allocation33_spill]] }
  0x1b   : > { %s368_s14 = sshll.u32 %s2175_s2, 4  ;;  %p1880_p6 = pnand %p1332_p4, %p59_p1  ;;  %s369_s14 = int_to_ptr.hbm [resolvable:$true] %s368_s14 }
  0x1c   : > { %s382_s21 = sshll.u32 %s2177_s3, 4  ;;  %s1749_s2 = smov 128   ;;  %s383_s21 = int_to_ptr.hbm [resolvable:$true] %s382_s21 }
  0x1d   : > { %1335 = dma.hbm_to_vmem [thread:$0]  (!%p1880_p6), %s369_s14, 512, %s371_s18, [#allocation7], %s1749_s2, %s1749_s2, %s1750_s19  }
  0x1e   : > { %s402_s29 = sshll.u32 %s2179_s6, 4  ;;  %s1751_s24 = smov [#allocation11]   ;;  %s403_s29 = int_to_ptr.hbm [resolvable:$true] %s402_s29 }
  0x1f   : > { %1338 = dma.hbm_to_vmem [thread:$0]  (!%p1880_p6), %s383_s21, 512, %s385_s17, [#allocation10], %s1749_s2, %s1749_s2, %s1750_s19  }
  0x20   : > { %s419_s23 = sshll.u32 %s2180_s8, 4  ;;  %s404_s30 = sshll.u32 %s1751_s24, 4  ;;  %s420_s23 = int_to_ptr.hbm [resolvable:$true] %s419_s23  ;;  %s405_s30 = int_to_ptr.vmem [resolvable:$true] %s404_s30 }
  0x21   : > { %1341 = dma.hbm_to_vmem [thread:$0]  (!%p1880_p6), %s403_s29, 512, %s405_s30, [#allocation10], %s1749_s2, %s1749_s2, %s1750_s19  }
  0x22   : > { %s1752_s14 = smov [#allocation12]   ;;  %s1261_s3 = sadd.s32 4294967294, %s1745_s28  }
  0x23   : > { %s421_s18 = sshll.u32 %s1752_s14, 4  ;;  %s1900_s21 = sadd.s32 1, %s1745_s28   ;;  %s422_s18 = int_to_ptr.vmem [resolvable:$true] %s421_s18 }
  0x24   : > { %1344 = dma.hbm_to_vmem [thread:$0]  (!%p1880_p6), %s420_s23, 512, %s422_s18, [#allocation13], %s1749_s2, %s1749_s2, %s1750_s19  }
  0x25   : > { %2181 = sst [smem:[#allocation27_spill]] %s1900_s21  ;;  %s42_s17 = ssub.s32 %s1745_s28, %s1900_s21 }
  0x26   : > { %s45_s20 = sadd.s32 1, %s1741_s27  ;;  %p43_p7 = scmp.eq.s32.totalorder %s42_s17, 0 }
  0x27   : > { %p52_p8 = scmp.ne.s32.totalorder %s1741_s27, %s1737_s26  ;;  %p53_p9 = scmp.eq.s32.totalorder %s1745_s28, 0 }
  0x28   : > { %p58_p10 = scmp.ne.s32.totalorder %s1737_s26, %s1733_s25  ;;  %p318_p13 = scmp.eq.s32.totalorder %s1863_s15, 1 }
  0x29   : > { %s1911_s29 = scalar_select %p43_p7, %s1741_s27, %s45_s20  }
  0x2a   : > { %p1913_p11 = por %p53_p9, %p52_p8  ;;  %p1919_p12 = por %p59_p1, %p58_p10 }
  0x2b   : > { %2182 = sst [smem:[#allocation28_spill]] %s1911_s29  ;;  %p324_p0 = scmp.eq.s32.totalorder %s1261_s3, 1 }
  0x2c   : > { %p1363_p2 = scmp.lt.s32.totalorder %s1745_s28, 2  ;;  %s444_s22 = sand.u32 1, %s1741_s27  }
  0x2d   : > { %p1926_p4 = por %p318_p13, %p52_p8  ;;  %p1930_p6 = por %p324_p0, %p58_p10 }
  0x2e   : > { %s1934_s30 = sshll.u32 %s444_s22, 3  ;;  %s1269_s14 = sshll.u32 %s1745_s28, 3 }
  0x2f   : > { %s2186_s23 = scalar_select %p1930_p6, 1, 0 }
  0x30   : > { %s452_s20 = scalar_lea.hbm %s2145_s0, %s1269_s14  ;;  %s448_s6 = scalar_lea.vmem [#allocation3], %s1934_s30 }
  0x31   : > { %2187 = sst [smem:[#allocation29_spill]] %s2186_s23  ;;  %s456_s3 = sshll.u32 %s448_s6, 4  ;;  %s457_s3 = int_to_ptr.vmem [resolvable:$true] %s456_s3 }
  0x32   : > { %s454_s8 = sshll.u32 %s452_s20, 4  ;;  %p1943_p7 = pnand %p1363_p2, %p1913_p11  ;;  %s455_s8 = int_to_ptr.hbm [resolvable:$true] %s454_s8 }
  0x33   : > { %s471_s23 = scalar_lea.hbm %s2146_s1, %s1269_s14  ;;  %s463_s25 = sand.u32 1, %s1745_s28  }
  0x34   : > { %s445_s11 = scalar_lea.sflag [#allocation4], %s444_s22  ;;  %s1571_s18 = sshra.s32 %s455_s8, 4  ;;  %s1572_s18 = int_to_ptr.hbm [resolvable:$true] %s1571_s18 }
  0x35   : > { %s1573_s17 = scalar_lea.hbm %s1572_s18, 8  ;;  %p1575_p9 = pneg %p1943_p7 }
  0x36   : > { %p1574_p8 = scmp.ne.s32.totalorder %s1572_s18, %s1573_s17  ;;  %s1578_s20 = scalar_lea.hbm %s2145_s0, 16 }
  0x37   : > { %p1579_p13 = scmp.lt.s32.totalorder %s1572_s18, %s2145_s0  ;;  %p1580_p0 = scmp.lt.s32.totalorder %s1578_s20, %s1573_s17 }
  0x38   : > { %p1576_p10 = pnand %p1575_p9, %p1574_p8 }
  0x39   : > { %p1581_p2 = por %p1580_p0, %p1579_p13 }
  0x3a   : > { %p1577_p11 = pneg %p1576_p10 }
  0x3c   : > { %p1582_p5 = pnand %p1581_p2, %p1577_p11 }
  0x3e   : > { %1585 = shalt.err (!%p1582_p5)
}
  0x3f   : > { %1348 = dma.hbm_to_vmem [thread:$0]  (!%p1943_p7), %s455_s8, 128, %s457_s3, %s445_s11  }
  0x40   : > { %s473_s22 = sshll.u32 %s471_s23, 4  ;;  %s467_s14 = scalar_lea.vmem [#allocation6], %s1934_s30  ;;  %s474_s22 = int_to_ptr.hbm [resolvable:$true] %s473_s22 }
  0x41   : > { %s475_s28 = sshll.u32 %s467_s14, 4  ;;  %s464_s6 = scalar_lea.sflag [#allocation7], %s463_s25  ;;  %s476_s28 = int_to_ptr.vmem [resolvable:$true] %s475_s28 }
  0x42   : > { %s1601_s24 = sshra.s32 %s474_s22, 4  ;;  %s1608_s20 = scalar_lea.hbm %s2146_s1, 16  ;;  %s1602_s24 = int_to_ptr.hbm [resolvable:$true] %s1601_s24 }
  0x43   : > { %s1603_s12 = scalar_lea.hbm %s1602_s24, 8  ;;  %p1609_p5 = scmp.lt.s32.totalorder %s1602_s24, %s2146_s1 }
  0x44   : > { %p1604_p8 = scmp.ne.s32.totalorder %s1602_s24, %s1603_s12  ;;  %p1610_p13 = scmp.lt.s32.totalorder %s1608_s20, %s1603_s12 }
  0x46   : > { %p1606_p10 = pnand %p1604_p8, %p1575_p9  ;;  %p1611_p0 = por %p1610_p13, %p1609_p5 }
  0x48   : > { %p1607_p11 = pneg %p1606_p10 }
  0x4a   : > { %p1612_p2 = pnand %p1611_p0, %p1607_p11 }
  0x4c   : > { %1615 = shalt.err (!%p1612_p2)
}
  0x4d   : > { %1351 = dma.hbm_to_vmem [thread:$0]  (!%p1943_p7), %s474_s22, 128, %s476_s28, %s464_s6  }
  0x4e   : > { %484 = sbr.rel (%p1868_p3) target bundleno = 1953 (0x7a1), region = 68  ;;  %s1979_s11 = sand.u32 (!%p1868_p3), 1, %s1737_s26  }
  0x4f   : > { %s1982_s25 = sshll.u32 (!%p1868_p3), %s1979_s11, 3  ;;  %s487_s23 = scalar_lea.sflag (!%p1868_p3), [#allocation4], %s1979_s11 }
  0x50   : > { %s490_s12 = scalar_lea.vmem (!%p1868_p3), [#allocation3], %s1982_s25 }
  0x53   : > { %1704 = dma.done.wait (%p1919_p12), %s487_s23, 128  }
  0x54   : > { %1706 = vsyncadd (%p1919_p12), %s487_s23, 4294967168  ;;  %s496_s28 = sand.u32 1, %s1863_s15   ;;  %s500_s29 = scalar_lea.vmem [#allocation6], %s1982_s25 }
  0x55   : > { %s497_s16 = scalar_lea.sflag [#allocation7], %s496_s28 }
  0x56   : > { %1708 = dma.done.wait (%p1919_p12), %s497_s16, 128  }
  0x57   : > { %1710 = vsyncadd (%p1919_p12), %s497_s16, 4294967168 }
  0x58   : > { %1712 = dma.done.wait (%p59_p1), [#allocation7], 512  }
  0x59   : > { %1714 = vsyncadd (%p59_p1), [#allocation7], 4294966784 }
  0x5a   : > { %1716 = dma.done.wait (%p59_p1), [#allocation10], 1024  }
  0x5b   : > { %1718 = vsyncadd (%p59_p1), [#allocation10], 4294966272 }
  0x5c   : > { %1720 = dma.done.wait (%p59_p1), [#allocation13], 512  }
  0x5d   : > { %1722 = vsyncadd (%p59_p1), [#allocation13], 4294966784  ;;  %v580_v0 = vld [vmem:[#allocation8 + $0x18] sm:$0xff]  ;;  %v579_v1 = vld [vmem:[#allocation8 + $0x10] sm:$0xff]  ;;  %vm581_vm0 = vcmask 261120   ;;  %s1753_s2 = smov 72  }
  0x5e   : > { %597 = vmatpush.msra.mxu0 %v580_v0  ;;  %v578_v2 = vld [vmem:[#allocation8 + $0x8] sm:$0xff]  ;;  %v577_v3 = vld [vmem:[#allocation8] sm:$0xff]  ;;  %s1754_s30 = smov 120   ;;  %s1755_s3 = smov 96   ;;  %vm608_vm1 = vcmask 64512   ;;  %v575_v13 = vld [vmem:[%s500_s29] sm:$0xff] }
  0x5f   : > { %v2008_v4 = vld [vmem:[%s490_s12] sm:$0xff]  ;;  %s1756_s21 = smov 112   ;;  %s1757_s22 = smov 80   ;;  %vm576_vm2 = vcmp.eq.f32.partialorder %v575_v13, 0.0  ;;  %vm745_vm3 = vcmask 130112   ;;  %vm819_vm4 = vcmask 195712  }
  0x60   : > { %598 = vmatpush.msra.mxu0 %v579_v1  ;;  %s1758_s14 = smov 88   ;;  %s1759_s6 = smov 104   ;;  %vm893_vm5 = vcmask 261312  }
  0x61   : > { %s1760_s24 = smov 64   ;;  %s1761_s18 = smov 40  }
  0x62   : > { %599 = vmatpush.msra.mxu0 %v578_v2  ;;  %s1762_s17 = smov 56   ;;  %s1763_s20 = smov 48   ;;  %v899_v2 = vld [vmem:[#allocation9 + $0x18] sm:$0xff] }
  0x63   : > { %s1280_s27 = sshll.u32 %s1979_s11, 5  ;;  %s1764_s23 = smov 16  }
  0x64   : > { %600 = vmatpush.msra.mxu0 %v577_v3  ;;  %s2045_s8 = scalar_lea.vmem [#allocation15], %s1280_s27  ;;  %s1765_s12 = smov 8   ;;  %v898_v3 = vld [vmem:[#allocation9 + $0x10] sm:$0xff] }
  0x65   : > { %1281 = vmatmul.msk.f32.vlgmr.msra.gmra.mxu0 %vm581_vm0, %v2008_v4  ;;  %s1766_s28 = smov 24  }
  0xe2   : > { %v2012_v5 = vpop.f32.mrf.mxu0 }
  0xe3   : > { %823 = vrot.lane.b32.xlu2 %v2012_v5, %s1753_s2  ;;  %673 = vrot.lane.b32.xlu1 %v2012_v5, %s1754_s30  ;;  %s1651_s30 = scalar_lea.hbm %s2158_s13, 64 }
  0xe4   : > { %606 = vrot.lane.b32.xlu0 %v2012_v5, %s1755_s3 }
  0xeb   : > { %747 = vrot.lane.b32.xlu2 %v2012_v5, %s1756_s21  ;;  %749 = vrot.lane.b32.xlu1 %v2012_v5, %s1757_s22 }
  0xec   : > { %675 = vrot.lane.b32.xlu0 %v2012_v5, %s1758_s14 }
  0xf4   : > { %821 = vrot.lane.b32.xlu0 %v2012_v5, %s1759_s6  ;;  %s1307_s6 = sshll.u32 %s1863_s15, 5 }
 0x13d   : > { %v824_v6 = vpop.permute.xlu2 %823 }
 0x13e   : > { %1293 = vmatpush.xpose.msk.msrb.mxu0 %vm608_vm1, %v824_v6  ;;  %v896_v6 = vld [vmem:[#allocation9] sm:$0xff] }
 0x145   : > { %v748_v11 = vpop.permute.xlu2 %747 }
 0x155   : > { %v674_v7 = vpop.permute.xlu1 %673 }
 0x156   : > { %v607_v8 = vpop.permute.xlu0 %606 }
 0x157   : > { %1282 = vmatpush.xpose.msk.msra.mxu1 %vm608_vm1, %v607_v8 }
 0x15a   : > { %1283 = vmatmul.msk.f32.vlgmr.msra.gmra.mxu1 %vm608_vm1, %v2012_v5 }
 0x15d   : > { %v750_v9 = vpop.permute.xlu1 %749 }
 0x15e   : > { %v676_v10 = vpop.permute.xlu0 %675  ;;  %1289 = vmatpush.xpose.msk.msrb.mxu1 %vm608_vm1, %v750_v9 }
 0x15f   : > { %1285 = vmatpush.xpose.msk.msra.mxu3 %vm608_vm1, %v676_v10 }
 0x162   : > { %1286 = vmatmul.msk.f32.vlgmr.msra.gmra.mxu3 %vm608_vm1, %v674_v7  ;;  %1290 = vmatmul.msk.f32.vlgmr.msrb.gmra.mxu1 %vm608_vm1, %v748_v11 }
 0x163   : > { %915 = vmatpush.msra.mxu1 %v899_v2 }
 0x165   : > { %916 = vmatpush.msra.mxu1 %v898_v3 }
 0x166   : > { %v822_v12 = vpop.permute.xlu0 %821 }
 0x167   : > { %1294 = vmatmul.msk.f32.vlgmr.msrb.gmra.mxu0 %vm608_vm1, %v822_v12 }
 0x1d7   : > { %v630_v14 = vpop.f32.mrf.mxu1 }
 0x1d8   : > { %v633_v15 = vsel %vm576_vm2, -1e+09, %v630_v14  ;;  %v1767_v14 = vmov 32.0  }
 0x1d9   : > { %v634_v16 = vsel %vm608_vm1, %v633_v15, -inf }
 0x1da   : > { %635 = vmax.xlane.f32.xlu1 %v634_v16 }
 0x1df   : > { %v772_v17 = vpop.f32.mrf.mxu1 }
 0x1e0   : > { %v775_v18 = vsel %vm576_vm2, -1e+09, %v772_v17 }
 0x1e1   : > { %v776_v19 = vsel %vm608_vm1, %v775_v18, -inf }
 0x1e2   : > { %777 = vmax.xlane.f32.xlu0 %v776_v19 }
 0x1e4   : > { %v846_v23 = vpop.f32.mrf.mxu0 }
 0x1e5   : > { %v698_v20 = vpop.f32.mrf.mxu3  ;;  %v849_v24 = vsel %vm576_vm2, -1e+09, %v846_v23 }
 0x1e6   : > { %v701_v21 = vsel %vm576_vm2, -1e+09, %v698_v20  ;;  %v850_v25 = vsel %vm608_vm1, %v849_v24, -inf }
 0x1e7   : > { %v702_v22 = vsel %vm608_vm1, %v701_v21, -inf }
 0x1e8   : > { %703 = vmax.xlane.f32.xlu2 %v702_v22 }
 0x1f0   : > { %851 = vmax.xlane.f32.xlu2 %v850_v25  ;;  %v965_v25 = vld [vmem:[#allocation11 + $0x18] sm:$0xff] }
 0x1f6   : > { %646 = vrot.lane.b32.xlu0 %v2012_v5, %s1760_s24  ;;  %s1091_s24 = sshll.u32 %s2045_s8, 4  ;;  %s1092_s24 = int_to_ptr.vmem [resolvable:$true] %s1091_s24 }
 0x1fe   : > { %863 = vrot.lane.b32.xlu0 %v2012_v5, %s1761_s18 }
 0x24d   : > { %v636_v26 = vpop.xlane.xlu1 %635 }
 0x24e   : > { %v637_v27 = vsub.f32 %v633_v15, %v636_v26  ;;  %v964_v26 = vld [vmem:[#allocation11 + $0x10] sm:$0xff] }
 0x250   : > { %v638_v28 = vmul.f32 1.442695, %v637_v27  ;;  %v963_v27 = vld [vmem:[#allocation11 + $0x8] sm:$0xff] }
 0x252   : > { %1429 = vpow2.f32 %v638_v28  ;;  %v962_v28 = vld [vmem:[#allocation11] sm:$0xff] }
 0x255   : > { %v778_v29 = vpop.xlane.xlu0 %777 }
 0x256   : > { %v779_v30 = vsub.f32 %v775_v18, %v778_v29  ;;  %v997_v29 = vld [vmem:[#allocation12 + $0x18] sm:$0xff] }
 0x257   : > { %1017 = vmatpush.msra.mxu0 %v997_v29 }
 0x258   : > { %v1430_v31 = vpop.eup %1429  ;;  %v780_v32 = vmul.f32 1.442695, %v779_v30 }
 0x259   : > { %v640_v33 = vsel %vm608_vm1, %v1430_v31, 0.0 }
 0x25a   : > { %1431 = vpow2.f32 %v780_v32  ;;  %641 = vadd.xlane.f32.xlu1 %v640_v33 }
 0x25b   : > { %v704_v34 = vpop.xlane.xlu2 %703 }
 0x25c   : > { %v705_v39 = vsub.f32 %v701_v21, %v704_v34 }
 0x25e   : > { %v706_v42 = vmul.f32 1.442695, %v705_v39  ;;  %v1423_v39 = vld [vmem:[%s2149_s4] ss:$0 sm:$0xff] }
 0x260   : > { %v1432_v35 = vpop.eup %1431 }
 0x261   : > { %v782_v36 = vsel %vm608_vm1, %v1432_v35, 0.0 }
 0x262   : > { %783 = vadd.xlane.f32.xlu1 %v782_v36 }
 0x263   : > { %v852_v37 = vpop.xlane.xlu2 %851 }
 0x264   : > { %v853_v38 = vsub.f32 %v849_v24, %v852_v37 }
 0x266   : > { %v854_v40 = vmul.f32 1.442695, %v853_v38 }
 0x268   : > { %1433 = vpow2.f32 %v854_v40  ;;  %v647_v41 = vpop.permute.xlu0 %646 }
 0x269   : > { %667 = vmatpush.msra.mxu2 %v647_v41  ;;  %1435 = vpow2.f32 %v706_v42  ;;  %v1424_v42 = vld [vmem:[%s2150_s5] ss:$0 sm:$0xff] }
 0x26e   : > { %v1434_v43 = vpop.eup %1433 }
 0x26f   : > { %v856_v44 = vsel %vm608_vm1, %v1434_v43, 0.0  ;;  %v1436_v45 = vpop.eup %1435 }
 0x270   : > { %857 = vadd.xlane.f32.xlu2 %v856_v44  ;;  %v708_v46 = vsel %vm608_vm1, %v1436_v45, 0.0  ;;  %v864_v58 = vpop.permute.xlu0 %863 }
 0x278   : > { %709 = vadd.xlane.f32.xlu2 %v708_v46  ;;  %v995_v46 = vld [vmem:[#allocation12 + $0x8] sm:$0xff] }
 0x27b   : > { %715 = vrot.lane.b32.xlu1 %v2012_v5, %s1762_s17 }
 0x290   : > { %789 = vrot.lane.b32.xlu2 %v2012_v5, %s1763_s20  ;;  %v897_v5 = vld [vmem:[#allocation9 + $0x8] sm:$0xff]  ;;  %s1090_s20 = scalar_lea.hbm %s2158_s13, %s1307_s6 }
 0x291   : > { %917 = vmatpush.msra.mxu1 %v897_v5  ;;  %s1093_s27 = sshll.u32 %s1090_s20, 4  ;;  %s1094_s27 = int_to_ptr.hbm [resolvable:$true] %s1093_s27 }
 0x293   : > { %918 = vmatpush.msra.mxu1 %v896_v6 }
 0x2cd   : > { %v642_v47 = vpop.xlane.xlu1 %641 }
 0x2ce   : > { %1437 = vrcp.f32 %v642_v47  ;;  %v994_v47 = vld [vmem:[#allocation12] sm:$0xff] }
 0x2d4   : > { %v1438_v48 = vpop.eup %1437 }
 0x2d5   : > { %v784_v49 = vpop.xlane.xlu1 %783  ;;  %v644_v50 = vmul.f32 %v1438_v48, %v1430_v31  ;;  %v1425_v48 = vld [vmem:[%s2152_s7] ss:$0 sm:$0xff] }
 0x2d6   : > { %1439 = vrcp.f32 %v784_v49 }
 0x2d7   : > { %645 = vst.msk [vmem:[%s2045_s8] sm:$0xff] %vm608_vm1, %v644_v50  ;;  %1284 = vmatmul.msk.f32.vlgmr.msra.gmra.mxu2 %vm608_vm1, %v644_v50 }
 0x2dc   : > { %v1440_v51 = vpop.eup %1439 }
 0x2dd   : > { %v786_v52 = vmul.f32 %v1440_v51, %v1432_v35 }
 0x2df   : > { %1291 = vst.msk [vmem:[%s2045_s8 + $0x10] sm:$0xff] %vm608_vm1, %v786_v52 }
 0x2e3   : > { %v858_v53 = vpop.xlane.xlu2 %857 }
 0x2e4   : > { %1441 = vrcp.f32 %v858_v53 }
 0x2ea   : > { %v1442_v54 = vpop.eup %1441 }
 0x2eb   : > { %v860_v55 = vmul.f32 %v1442_v54, %v1434_v43  ;;  %v710_v56 = vpop.xlane.xlu2 %709 }
 0x2ec   : > { %1443 = vrcp.f32 %v710_v56 }
 0x2ed   : > { %1295 = vst.msk [vmem:[%s2045_s8 + $0x18] sm:$0xff] %vm608_vm1, %v860_v55  ;;  %v716_v57 = vpop.permute.xlu1 %715  ;;  %1445 = vrcp.f32 %v1767_v14 }
 0x2ee   : > { %736 = vmatpush.msrb.mxu2 %v716_v57 }
 0x2f0   : > { %884 = vmatpush.msra.mxu2 %v864_v58 }
 0x2f2   : > { %v1444_v59 = vpop.eup %1443 }
 0x2f3   : > { %v790_v60 = vpop.permute.xlu2 %789  ;;  %v712_v61 = vmul.f32 %v1444_v59, %v1436_v45  ;;  %v1446_v15 = vpop.eup %1445  ;;  %v996_v45 = vld [vmem:[#allocation12 + $0x10] sm:$0xff] }
 0x2f4   : > { %810 = vmatpush.msrb.mxu3 %v790_v60  ;;  %v929_v16 = vmul.f32 32.0, %v1446_v15  ;;  %vm933_vm6 = vweird.f32 %v1446_v15  ;;  %1018 = vmatpush.msra.mxu0 %v996_v45 }
 0x2f5   : > { %1287 = vst.msk [vmem:[%s2045_s8 + $0x8] sm:$0xff] %vm608_vm1, %v712_v61  ;;  %1288 = vmatmul.msk.f32.vlgmr.msrb.gmra.mxu2 %vm608_vm1, %v712_v61  ;;  %1292 = vmatmul.msk.f32.vlgmr.msrb.gmra.mxu3 %vm608_vm1, %v786_v52  ;;  %v1426_v52 = vld [vmem:[%s2154_s9] ss:$0 sm:$0xff] }
 0x2f6   : > { %v930_v17 = vsub.f32 1.0, %v929_v16  ;;  %985 = vmatpush.msra.mxu3 %v965_v25  ;;  %1019 = vmatpush.msra.mxu0 %v995_v46 }
 0x2f8   : > { %v931_v18 = vmul.f32 %v1446_v15, %v930_v17  ;;  %986 = vmatpush.msra.mxu3 %v964_v26  ;;  %1020 = vmatpush.msra.mxu0 %v994_v47 }
 0x2fa   : > { %v932_v19 = vadd.f32 %v1446_v15, %v931_v18  ;;  %987 = vmatpush.msra.mxu3 %v963_v27 }
 0x2fc   : > { %v2064_v20 = vsel %vm933_vm6, %v1446_v15, %v932_v19  ;;  %988 = vmatpush.msra.mxu3 %v962_v28 }
 0x2fd   : > { %1296 = vmatmul.msk.f32.vlgmr.msra.gmra.mxu2 %vm608_vm1, %v860_v55 }
 0x35a   : > { %v669_v62 = vpop.f32.mrf.mxu2 }
 0x35b   : > { %672 = vst.msk [vmem:[#allocation2] sm:$0xff] %vm608_vm1, %v669_v62 }
 0x378   : > { %v738_v63 = vpop.f32.mrf.mxu2  ;;  %v812_v0 = vpop.f32.mrf.mxu3 }
 0x379   : > { %816 = vrot.lane.b32.xlu1 %v812_v0, %s1764_s23  ;;  %742 = vrot.lane.b32.xlu0 %v738_v63, %s1765_s12  ;;  %s1065_s23 = scalar_lea.sflag [#allocation16], %s1979_s11 }
 0x380   : > { %v886_v1 = vpop.f32.mrf.mxu2 }
 0x381   : > { %890 = vrot.lane.b32.xlu0 %v886_v1, %s1766_s28  ;;  %s1645_s28 = sshra.s32 %s1094_s27, 4  ;;  %s1646_s28 = int_to_ptr.hbm [resolvable:$true] %s1645_s28 }
 0x382   : > { %s1647_s16 = scalar_lea.hbm %s1646_s28, 32  ;;  %p1652_p7 = scmp.lt.s32.totalorder %s1646_s28, %s2158_s13 }
 0x383   : > { %p1648_p1 = scmp.ne.s32.totalorder %s1646_s28, %s1647_s16  ;;  %p1653_p9 = scmp.lt.s32.totalorder %s1651_s30, %s1647_s16 }
 0x385   : > { %p1649_p3 = pnand %p1648_p1, %p1926_p4  ;;  %p1654_p8 = por %p1653_p9, %p1652_p7 }
 0x387   : > { %p1650_p12 = pneg %p1649_p3 }
 0x389   : > { %p1655_p10 = pnand %p1654_p8, %p1650_p12 }
 0x3eb   : > { %v817_v7 = vpop.permute.xlu1 %816  ;;  %v743_v8 = vpop.permute.xlu0 %742 }
 0x3ec   : > { %746 = vst.msk [vmem:[#allocation2] sm:$0xff] %vm745_vm3, %v743_v8 }
 0x3ed   : > { %820 = vst.msk [vmem:[#allocation2] sm:$0xff] %vm819_vm4, %v817_v7 }
 0x3f3   : > { %v891_v9 = vpop.permute.xlu0 %890 }
 0x3f4   : > { %894 = vst.msk [vmem:[#allocation2] sm:$0xff] %vm893_vm5, %v891_v9 }
 0x3fb   : > { %v895_v10 = vld [vmem:[#allocation2] sm:$0xff] }
 0x3fc   : > { %1297 = vmatmul.msk.f32.vlgmr.msra.gmra.mxu1 %vm581_vm0, %v895_v10 }
 0x479   : > { %v920_v11 = vpop.f32.mrf.mxu1 }
 0x47a   : > { %v921_v12 = vadd.f32 %v920_v11, %v2008_v4 }
 0x47c   : > { %v925_v13 = vsel %vm581_vm0, %v921_v12, 0.0 }
 0x47d   : > { %926 = vadd.xlane.f32.xlu2 %v925_v13 }
 0x4f0   : > { %v927_v21 = vpop.xlane.xlu2 %926 }
 0x4f1   : > { %v935_v22 = vmul.f32 %v2064_v20, %v927_v21 }
 0x4f3   : > { %v936_v23 = vsub.f32 %v921_v12, %v935_v22 }
 0x4f5   : > { %v937_v24 = vmul.f32 %v936_v23, %v936_v23 }
 0x4f7   : > { %v938_v4 = vsel %vm581_vm0, %v937_v24, 0.0 }
 0x4f8   : > { %939 = vadd.xlane.f32.xlu1 %v938_v4 }
 0x56b   : > { %v940_v30 = vpop.xlane.xlu1 %939 }
 0x56c   : > { %v941_v31 = vmul.f32 %v940_v30, %v2064_v20 }
 0x56e   : > { %v942_v32 = vadd.f32 1e-06, %v941_v31 }
 0x570   : > { %1447 = vrsqrt.f32 %v942_v32  ;;  %vm949_vm8 = vweird.f32 %v942_v32 }
 0x576   : > { %v1448_v33 = vpop.eup %1447 }
 0x577   : > { %v944_v34 = vmul.f32 %v1448_v33, %v942_v32  ;;  %vm950_vm7 = vweird.f32 %v1448_v33 }
 0x578   : > { %vm951_vm9 = vmor %vm949_vm8, %vm950_vm7 }
 0x579   : > { %v945_v35 = vmul.f32 %v1448_v33, %v944_v34 }
 0x57b   : > { %v946_v36 = vmul.f32 0.5, %v945_v35 }
 0x57d   : > { %v947_v37 = vsub.f32 1.5, %v946_v36 }
 0x57f   : > { %v948_v38 = vmul.f32 %v1448_v33, %v947_v37 }
 0x581   : > { %v952_v40 = vsel %vm951_vm9, %v1448_v33, %v948_v38 }
 0x582   : > { %v953_v41 = vmul.f32 %v952_v40, %v936_v23 }
 0x584   : > { %v957_v43 = vmul.f32 %v1423_v39, %v953_v41 }
 0x586   : > { %v961_v44 = vadd.f32 %v1424_v42, %v957_v43 }
 0x588   : > { %1298 = vmatmul.msk.f32.vlgmr.msra.gmra.mxu3 %vm581_vm0, %v961_v44 }
 0x60b   : > { %v990_v49 = vpop.f32.mrf.mxu3 }
 0x60c   : > { %v991_v50 = vadd.f32 %v1425_v48, %v990_v49 }
 0x60e   : > { %v993_v51 = vmax.f32 %v991_v50, 0.0 }
 0x610   : > { %1299 = vmatmul.msk.f32.vlgmr.msra.gmra.mxu0 %vm581_vm0, %v993_v51 }
 0x68d   : > { %v1022_v53 = vpop.f32.mrf.mxu0 }
 0x68e   : > { %v1023_v54 = vadd.f32 %v1426_v52, %v1022_v53 }
 0x690   : > { %v1025_v55 = vadd.f32 %v1023_v54, %v961_v44 }
 0x692   : > { %v1028_v56 = vsel %vm581_vm0, %v1025_v55, 0.0 }
 0x693   : > { %1029 = vadd.xlane.f32.xlu0 %v1028_v56 }
 0x706   : > { %v1030_v57 = vpop.xlane.xlu0 %1029 }
 0x707   : > { %v1031_v58 = vmul.f32 %v1030_v57, %v2064_v20 }
 0x709   : > { %v1032_v59 = vsub.f32 %v1025_v55, %v1031_v58 }
 0x70b   : > { %v1033_v60 = vmul.f32 %v1032_v59, %v1032_v59 }
 0x70d   : > { %v1034_v61 = vsel %vm581_vm0, %v1033_v60, 0.0 }
 0x70e   : > { %1035 = vadd.xlane.f32.xlu2 %v1034_v61 }
 0x70f   : > { %1658 = shalt.err (!%p1655_p10)
}
 0x710   : > { %s1768_s21 = smov 128   ;;  %s1302_s22 = sshll.u32 %s1863_s15, 3  ;;  %v1427_v8 = vld [vmem:[%s2155_s10] ss:$0 sm:$0xff] }
 0x711   : > { %1329 = dma.vmem_to_hbm [thread:$0]  (%p1926_p4), %s1092_s24, 512, %s1094_s27, %s1065_s23, %s1768_s21, %s1768_s21, %s1765_s12  }
 0x712   : > { %s2189_s18 = sld [smem:[#allocation35_spill]]  ;;  %s566_s15 = scalar_lea.vmem [#allocation14], %s1982_s25 }
 0x713   : > { %s2190_s23 = sld [smem:[#allocation34_spill]]  ;;  %s1077_s28 = sshll.u32 %s566_s15, 4  ;;  %s1078_s28 = int_to_ptr.vmem [resolvable:$true] %s1077_s28 }
 0x714   : > { %s1060_s29 = scalar_lea.sflag [#allocation5], %s1979_s11 }
 0x718   : > { %s1075_s17 = scalar_lea.hbm %s2189_s18, %s1302_s22  ;;  %s1679_s25 = scalar_lea.hbm %s2189_s18, 16 }
 0x719   : > { %v1428_v11 = vld [vmem:[%s2190_s23] ss:$0 sm:$0xff]  ;;  %s1079_s16 = sshll.u32 %s1075_s17, 4  ;;  %s1080_s16 = int_to_ptr.hbm [resolvable:$true] %s1079_s16 }
 0x71a   : > { %s1673_s2 = sshra.s32 %s1080_s16, 4  ;;  %s1674_s2 = int_to_ptr.hbm [resolvable:$true] %s1673_s2 }
 0x71b   : > { %s1675_s30 = scalar_lea.hbm %s1674_s2, 8  ;;  %p1680_p0 = scmp.lt.s32.totalorder %s1674_s2, %s2189_s18 }
 0x71c   : > { %p1676_p11 = scmp.ne.s32.totalorder %s1674_s2, %s1675_s30  ;;  %p1681_p2 = scmp.lt.s32.totalorder %s1679_s25, %s1675_s30 }
 0x71e   : > { %p1677_p5 = pnand %p1676_p11, %p1926_p4  ;;  %p1682_p1 = por %p1681_p2, %p1680_p0 }
 0x720   : > { %p1678_p13 = pneg %p1677_p5 }
 0x722   : > { %p1683_p3 = pnand %p1682_p1, %p1678_p13 }
 0x781   : > { %v1036_v62 = vpop.xlane.xlu2 %1035 }
 0x782   : > { %v1037_v63 = vmul.f32 %v1036_v62, %v2064_v20 }
 0x784   : > { %v1038_v0 = vadd.f32 1e-06, %v1037_v63 }
 0x786   : > { %1449 = vrsqrt.f32 %v1038_v0  ;;  %vm1045_vm11 = vweird.f32 %v1038_v0 }
 0x78c   : > { %v1450_v1 = vpop.eup %1449 }
 0x78d   : > { %v1040_v2 = vmul.f32 %v1450_v1, %v1038_v0  ;;  %vm1046_vm10 = vweird.f32 %v1450_v1 }
 0x78e   : > { %vm1047_vm12 = vmor %vm1045_vm11, %vm1046_vm10 }
 0x78f   : > { %v1041_v3 = vmul.f32 %v1450_v1, %v1040_v2 }
 0x791   : > { %v1042_v5 = vmul.f32 0.5, %v1041_v3 }
 0x793   : > { %v1043_v6 = vsub.f32 1.5, %v1042_v5 }
 0x795   : > { %v1044_v7 = vmul.f32 %v1450_v1, %v1043_v6 }
 0x797   : > { %v1048_v9 = vsel %vm1047_vm12, %v1450_v1, %v1044_v7 }
 0x798   : > { %v1049_v10 = vmul.f32 %v1048_v9, %v1032_v59 }
 0x79a   : > { %v1053_v12 = vmul.f32 %v1427_v8, %v1049_v10 }
 0x79c   : > { %v1057_v13 = vadd.f32 %v1428_v11, %v1053_v12 }
 0x79e   : > { %1058 = vst.msk [vmem:[%s566_s15] sm:$0xff] %vm581_vm0, %v1057_v13 }
 0x79f   : > { %1686 = shalt.err (!%p1683_p3)
}
 0x7a0   : > { %1328 = dma.vmem_to_hbm [thread:$0]  (%p1926_p4), %s1078_s28, 128, %s1080_s16, %s1060_s29  }
 0x7a1 PF: > { %s2191_s11 = sld [smem:[#allocation24_spill]] }
 0x7a2   : > { %s2193_s6 = sld [smem:[#allocation26_spill]] }
 0x7a7   : > { %s1108_s12 = sand.u32 1, %s2191_s11  }
 0x7a8   : > { %p2194_p12 = scmp.ge.s32.totalorder %s2193_s6, 2  ;;  %s1109_s24 = scalar_lea.sflag [#allocation5], %s1108_s12 }
 0x7aa   : > { %p1353_p7 = pnand %p2194_p12, %p1930_p6 }
 0x7ac   : > { %p1354_p9 = pneg %p1353_p7 }
 0x7ae   : > { %1724 = dma.done.wait (%p1354_p9), %s1109_s24, 128  }
 0x7af   : > { %1726 = vsyncadd (%p1354_p9), %s1109_s24, 4294967168  ;;  %s1119_s17 = scalar_lea.sflag [#allocation16], %s1108_s12 }
 0x7b0   : > { %1728 = dma.done.wait (%p1354_p9), %s1119_s17, 512  }
 0x7b1   : > { %1730 = vsyncadd (%p1354_p9), %s1119_s17, 4294966784  ;;  %s2195_s28 = sld [smem:[#allocation27_spill]]  ;;  %s2198_s25 = smov %s1737_s26 }
 0x7b2   : > { %s2196_s20 = sld [smem:[#allocation25_spill]] }
 0x7b3   : > { %s2197_s27 = sld [smem:[#allocation28_spill]] }
 0x7b7   : > { %p35_p4 = scmp.ge.s32.totalorder %s2195_s28, 4  }
 0x7b8   : > { %s2199_s26 = smov %s2196_s20 }
 0x7b9   :  { %37 = sbr.rel (!%p35_p4) target bundleno = 18 (0x12), region = 162 }
 0x7be   :  { %1125 = vsyncpa [#allocation4], 1 }
 0x7bf   :  { %1127 = vsyncpa [#allocation4 + $0x1], 1 }
 0x7c0   :  { %1128 = vsyncpa [#allocation7], 1 }
 0x7c1   :  { %1130 = vsyncpa [#allocation7 + $0x1], 1 }
 0x7c2   :  { %1131 = vsyncpa [#allocation10], 1 }
 0x7c3   :  { %1132 = vsyncpa [#allocation13], 1 }
 0x7c4   :  { %1133 = vsyncpa [#allocation5], 1 }
 0x7c5   :  { %1135 = vsyncpa [#allocation5 + $0x1], 1 }
 0x7c6   :  { %1136 = vsyncpa [#allocation16], 1 }
 0x7c7   :  { %1138 = vsyncpa [#allocation16 + $0x1], 1 }

</bundles_post_ra>
